<compile_context>
chip_gen: v5e
topology: v5e:2x2
jax: 0.10.0
libtpu: 0.0.40
codegen_flags: <defaults>
</compile_context>

<pallas_src>
import functools

import jax
import jax.numpy as jnp
from jax.experimental import pallas as pl
from jax.experimental.pallas import tpu as pltpu


# ----------------------------- kernels ------------------------------------ #

def _mlp_kernel_inplace(x_ref, w1_ref, b1_ref, w2_ref, b2_ref, o_ref, *,
                        compute_dtype):
    """f32-output variant: accumulate straight into the resident output tile."""
    h_idx = pl.program_id(1)

    @pl.when(h_idx == 0)
    def _():
        o_ref[...] = jnp.broadcast_to(b2_ref[...], o_ref.shape).astype(o_ref.dtype)

    xb = x_ref[...].astype(compute_dtype)
    h = jnp.dot(xb, w1_ref[...].astype(compute_dtype),
                preferred_element_type=jnp.float32)
    # Matches create_mlp_cls: partial(F.gelu, approximate='tanh').
    h = jax.nn.gelu(h + b1_ref[...].astype(jnp.float32), approximate=True)
    p = jnp.dot(h.astype(compute_dtype), w2_ref[...].astype(compute_dtype),
                preferred_element_type=jnp.float32)
    o_ref[...] += p.astype(o_ref.dtype)


def _mlp_kernel_scratch(x_ref, w1_ref, b1_ref, w2_ref, b2_ref, o_ref, acc_ref,
                        *, compute_dtype):
    """Narrow-output variant (e.g. bf16): f32 VMEM accumulator, cast at the end."""
    h_idx = pl.program_id(1)

    @pl.when(h_idx == 0)
    def _():
        acc_ref[...] = jnp.zeros_like(acc_ref)

    xb = x_ref[...].astype(compute_dtype)
    h = jnp.dot(xb, w1_ref[...].astype(compute_dtype),
                preferred_element_type=jnp.float32)
    h = jax.nn.gelu(h + b1_ref[...].astype(jnp.float32), approximate=True)
    acc_ref[...] += jnp.dot(h.astype(compute_dtype),
                            w2_ref[...].astype(compute_dtype),
                            preferred_element_type=jnp.float32)

    @pl.when(h_idx == pl.num_programs(1) - 1)
    def _():
        o_ref[...] = (acc_ref[...] + b2_ref[...].astype(jnp.float32)
                      ).astype(o_ref.dtype)


# ----------------------------- helpers ------------------------------------ #

def _round_up(x, m):
    return (x + m - 1) // m * m


def _cdiv(a, b):
    return (a + b - 1) // b


def _vmem_capacity_bytes():
    try:
        return int(pltpu.get_tpu_info().vmem_capacity_bytes)
    except Exception:
        return 64 * 1024 * 1024   # v7x-sized conservative fallback


def _tile_vmem_bytes(tm, th, d_in, d_out_p, x_bpe, w_bpe, out_bpe, use_scratch):
    """Per-grid-point VMEM footprint with default double-buffering."""
    nbuf = 2
    b = nbuf * tm * d_in * x_bpe          # x row tile
    b += nbuf * d_in * th * w_bpe         # w1 column tile (untiled d_in!)
    b += nbuf * 8 * th * w_bpe            # b1 (sublane-padded)
    b += nbuf * th * d_out_p * w_bpe      # w2 row tile
    b += nbuf * 8 * d_out_p * w_bpe       # b2
    b += nbuf * tm * d_out_p * out_bpe    # output tile
    if use_scratch:
        b += tm * d_out_p * 4             # f32 accumulator
    return b


# ----------------------------- wrapper ------------------------------------ #

def mlp_pallas(x, w1, b1, w2, b2, *, tm=None, th=None,
               compute_dtype=jnp.bfloat16, return_residual=False,
               vmem_limit_bytes=None):
    """MLP forward: gelu_tanh(x @ w1 + b1) @ w2 + b2.

    x  : (..., D_in)
    w1 : (D_in, H)      (== fc1.weight.T)     b1 : (H,)
    w2 : (H, D_out)     (== fc2.weight.T)     b2 : (D_out,)

    Matmuls are fed in `compute_dtype` (bf16 by default) and accumulated in
    f32; pass bf16 weights to also halve the HBM weight stream.
    """
    orig_shape = x.shape
    d_in = orig_shape[-1]
    hidden = w1.shape[1]
    d_out = w2.shape[1]
    assert w1.shape[0] == d_in and w2.shape[0] == hidden
    assert b1.shape == (hidden,) and b2.shape == (d_out,)

    x2d = x.reshape(-1, d_in)
    m = x2d.shape[0]
    out_dtype = x.dtype

    # ---- Pad hidden to a 128 multiple: zero cols/rows contribute nothing. ----
    hidden_p = _round_up(hidden, 128)
    if hidden_p != hidden:
        w1 = jnp.pad(w1, ((0, 0), (0, hidden_p - hidden)))
        b1 = jnp.pad(b1, (0, hidden_p - hidden))
        w2 = jnp.pad(w2, ((0, hidden_p - hidden), (0, 0)))

    # ---- Pad d_out to a lane-dense multiple of 128 (unmasked stores). -------
    d_out_p = _round_up(d_out, 128)
    if d_out_p != d_out:
        w2 = jnp.pad(w2, ((0, 0), (0, d_out_p - d_out)))
        b2 = jnp.pad(b2, (0, d_out_p - d_out))

    b1_2d = b1.reshape(1, hidden_p)
    b2_2d = b2.reshape(1, d_out_p)

    # ---- Hidden tile: largest 128-multiple divisor of hidden_p <= cap. ------
    if th is None:
        th_cap = min(1024, hidden_p)
        th = 128
        for cand in range(th_cap, 127, -128):
            if hidden_p % cand == 0:
                th = cand
                break
    assert hidden_p % th == 0 and (th % 128 == 0 or th == hidden_p)

    # ---- Row tile: 16-aligned (bf16 sublane packing), ragged last tile OK. --
    if tm is None:
        tm = 512
    tm = max(16, _round_up(min(tm, m), 16))

    use_scratch = out_dtype != jnp.float32
    x_bpe = jnp.dtype(x.dtype).itemsize
    w_bpe = jnp.dtype(w1.dtype).itemsize
    out_bpe = jnp.dtype(out_dtype).itemsize

    # ---- VMEM budget: never request the whole physical VMEM (v7x = 64 MiB). -
    cap = _vmem_capacity_bytes()
    budget_cap = (cap * 3) // 4
    if vmem_limit_bytes is None:
        vmem_limit_bytes = budget_cap
    else:
        vmem_limit_bytes = min(int(vmem_limit_bytes), budget_cap)
    tile_budget = max(vmem_limit_bytes - 2 * 1024 * 1024, 4 * 1024 * 1024)

    # Auto-shrink th then tm until the tile plan fits the budget.
    while _tile_vmem_bytes(tm, th, d_in, d_out_p, x_bpe, w_bpe, out_bpe,
                           use_scratch) > tile_budget:
        shrunk = False
        if th > 128:
            new_th = th - 128
            while new_th > 128 and hidden_p % new_th:
                new_th -= 128
            if new_th >= 128 and hidden_p % new_th == 0:
                th, shrunk = new_th, True
        if not shrunk and tm > 64:
            tm = max(64, _round_up(tm // 2, 16))
            shrunk = True
        if not shrunk:
            break  # TODO(synk): tile d_in as a third grid axis if still over.

    # ---- Ensure >=2 row tiles for large m so v7x's 2 TCs both get work. -----
    if m >= 256 and _cdiv(m, tm) == 1:
        tm = max(16, _round_up(_cdiv(m, 2), 16))

    n_m = _cdiv(m, tm)
    n_h = hidden_p // th

    flops = 2 * m * d_in * hidden_p + 2 * m * hidden_p * d_out_p
    bytes_accessed = (m * d_in * x_bpe
                      + n_m * (d_in * hidden_p + hidden_p * d_out_p) * w_bpe
                      + (hidden_p + d_out_p) * w_bpe
                      + m * d_out_p * out_bpe)
    cost = pl.CostEstimate(flops=flops, transcendentals=m * hidden_p,
                           bytes_accessed=int(bytes_accessed))

    if use_scratch:
        kernel = functools.partial(_mlp_kernel_scratch, compute_dtype=compute_dtype)
        scratch_shapes = [pltpu.VMEM((tm, d_out_p), jnp.float32)]
    else:
        kernel = functools.partial(_mlp_kernel_inplace, compute_dtype=compute_dtype)
        scratch_shapes = []

    out = pl.pallas_call(
        kernel,
        out_shape=jax.ShapeDtypeStruct((m, d_out_p), out_dtype),
        grid_spec=pltpu.PrefetchScalarGridSpec(
            num_scalar_prefetch=0,
            grid=(n_m, n_h),
            in_specs=[
                pl.BlockSpec((tm, d_in), lambda i, h: (i, 0)),        # x rows
                pl.BlockSpec((d_in, th), lambda i, h: (0, h)),        # w1 col-tile
                pl.BlockSpec((1, th), lambda i, h: (0, h)),           # b1 tile
                pl.BlockSpec((th, d_out_p), lambda i, h: (h, 0)),     # w2 row-tile
                pl.BlockSpec((1, d_out_p), lambda i, h: (0, 0)),      # b2 (const)
            ],
            out_specs=pl.BlockSpec((tm, d_out_p), lambda i, h: (i, 0)),
            scratch_shapes=scratch_shapes,
        ),
        compiler_params=pltpu.CompilerParams(
            dimension_semantics=("parallel", "arbitrary"),
            vmem_limit_bytes=int(vmem_limit_bytes),
        ),
        cost_estimate=cost,
    )(x2d, w1, b1_2d, w2, b2_2d)

    y = out[:, :d_out] if d_out_p != d_out else out
    y = y.reshape(*orig_shape[:-1], d_out)
    return (y, x) if return_residual else y


def init_mlp_params(key, in_features, hidden_features=None, out_features=None,
                    dtype=jnp.float32):
    """Deterministic init (uniform +-1/sqrt(fan_in)); weights stored as (in, out)."""
    hidden_features = hidden_features or in_features
    out_features = out_features or in_features
    k1, k2, k3, k4 = jax.random.split(key, 4)
    bound1 = 1.0 / (in_features ** 0.5)
    bound2 = 1.0 / (hidden_features ** 0.5)
    w1 = jax.random.uniform(k1, (in_features, hidden_features), dtype,
                            minval=-bound1, maxval=bound1)
    b1 = jax.random.uniform(k2, (hidden_features,), dtype,
                            minval=-bound1, maxval=bound1)
    w2 = jax.random.uniform(k3, (hidden_features, out_features), dtype,
                            minval=-bound2, maxval=bound2)
    b2 = jax.random.uniform(k4, (out_features,), dtype,
                            minval=-bound2, maxval=bound2)
    return w1, b1, w2, b2


if __name__ == "__main__":
    key = jax.random.PRNGKey(0)
    k_x, k_p = jax.random.split(key)

    # Small shapes consistent with the module (d_inner = 4 * d_model).
    batch, seq, d_model = 2, 100, 64       # m = 200 (ragged row tiles, no padding)
    hidden = 4 * d_model                   # 256
    d_out = d_model                        # 64 -> lane-padded to 128 internally

    x = jax.random.normal(k_x, (batch, seq, d_model), dtype=jnp.float32)
    w1, b1, w2, b2 = init_mlp_params(k_p, d_model, hidden, d_out)

    def ref_mlp(xr, w1r, b1r, w2r, b2r, compute_dtype=jnp.bfloat16):
        # Same math as the PyTorch Mlp (fc1 -> tanh GELU -> fc2), with the
        # kernel's bf16 MXU feeds / f32 accumulation reproduced.
        h = jnp.dot(xr.astype(compute_dtype), w1r.astype(compute_dtype),
                    preferred_element_type=jnp.float32) + b1r.astype(jnp.float32)
        h = jax.nn.gelu(h, approximate=True)
        y = jnp.dot(h.astype(compute_dtype), w2r.astype(compute_dtype),
                    preferred_element_type=jnp.float32) + b2r.astype(jnp.float32)
        return y.astype(xr.dtype)

    # f32 in / f32 out: accumulate-in-output kernel, 2 row tiles x 2 hidden
    # tiles, ragged last row tile, lane-padded output columns.
    y = mlp_pallas(x, w1, b1, w2, b2, tm=128, th=128)
    y = jax.block_until_ready(y)
    y_ref = ref_mlp(x, w1, b1, w2, b2)
    assert y.shape == (batch, seq, d_out)
    assert jnp.allclose(y, y_ref, atol=5e-3, rtol=5e-3), \
        float(jnp.max(jnp.abs(y - y_ref)))

    # bf16 in / bf16 out: f32 scratch-accumulator path, auto tile selection.
    xb = x.astype(jnp.bfloat16)
    w1b, b1b, w2b, b2b = (a.astype(jnp.bfloat16) for a in (w1, b1, w2, b2))
    yb = mlp_pallas(xb, w1b, b1b, w2b, b2b)
    yb = jax.block_until_ready(yb)
    yb_ref = ref_mlp(xb, w1b, b1b, w2b, b2b)
    assert jnp.allclose(yb.astype(jnp.float32), yb_ref.astype(jnp.float32),
                        atol=5e-2, rtol=5e-2), \
        float(jnp.max(jnp.abs(yb.astype(jnp.float32) - yb_ref.astype(jnp.float32))))

    print("KERNEL_OK")
</pallas_src>

<mosaic_0001>
module attributes {stable_mosaic.version = 11 : i64} {
  func.func @_mlp_kernel_inplace(%arg0: i32, %arg1: i32, %arg2: memref<128x64xf32, #tpu.memory_space<vmem>>, %arg3: memref<64x128xf32, #tpu.memory_space<vmem>>, %arg4: memref<1x128xf32, #tpu.memory_space<vmem>>, %arg5: memref<128x128xf32, #tpu.memory_space<vmem>>, %arg6: memref<1x128xf32, #tpu.memory_space<vmem>>, %arg7: memref<128x128xf32, #tpu.memory_space<vmem>>) attributes {dimension_semantics = [#tpu.dimension_semantics<parallel>, #tpu.dimension_semantics<arbitrary>], iteration_bounds = array<i64: 2, 2>, scalar_prefetch = 0 : i64, scratch_operands = 0 : i64, tpu.core_type = #tpu.core_type<tc>, window_params = [{transform_indices = @transform_0, window_bounds = array<i64: 128, 64>}, {transform_indices = @transform_1, window_bounds = array<i64: 64, 128>}, {transform_indices = @transform_2, window_bounds = array<i64: 1, 128>}, {transform_indices = @transform_3, window_bounds = array<i64: 128, 128>}, {pipeline_mode = #tpu.pipeline_mode<synchronous>, transform_indices = @transform_4, window_bounds = array<i64: 1, 128>}, {transform_indices = @transform_5, window_bounds = array<i64: 128, 128>}]} {
    %c0_i32 = arith.constant 0 : i32
    %0 = arith.cmpi eq, %arg1, %c0_i32 : i32
    %1 = arith.extui %0 : i1 to i32
    %c0_i32_0 = arith.constant 0 : i32
    %2 = arith.cmpi ne, %1, %c0_i32_0 : i32
    scf.if %2 {
      %c0_17 = arith.constant 0 : index
      %c0_18 = arith.constant 0 : index
      %31 = vector.load %arg6[%c0_17, %c0_18] : memref<1x128xf32, #tpu.memory_space<vmem>>, vector<1x128xf32>
      %32 = vector.shape_cast %31 : vector<1x128xf32> to vector<1x128xf32>
      %33 = vector.broadcast %32 : vector<1x128xf32> to vector<128x128xf32>
      %c0_19 = arith.constant 0 : index
      %c0_20 = arith.constant 0 : index
      %34 = vector.load %arg7[%c0_19, %c0_20] : memref<128x128xf32, #tpu.memory_space<vmem>>, vector<128x128xf32>
      tpu.vector_store %arg7[%c0_19, %c0_20], %33 {strides = array<i32>} : memref<128x128xf32, #tpu.memory_space<vmem>>, vector<128x128xf32>,
    } else {
    }
    %c0 = arith.constant 0 : index
    %c0_1 = arith.constant 0 : index
    %3 = vector.load %arg2[%c0, %c0_1] : memref<128x64xf32, #tpu.memory_space<vmem>>, vector<128x64xf32>
    %4 = arith.truncf %3 : vector<128x64xf32> to vector<128x64xbf16>
    %c0_2 = arith.constant 0 : index
    %c0_3 = arith.constant 0 : index
    %5 = vector.load %arg3[%c0_2, %c0_3] : memref<64x128xf32, #tpu.memory_space<vmem>>, vector<64x128xf32>
    %6 = arith.truncf %5 : vector<64x128xf32> to vector<64x128xbf16>
    %cst = arith.constant dense<0.000000e+00> : vector<128x128xf32>
    %7 = tpu.matmul %4, %6, %cst {dimension_numbers = #tpu.dot_dimension_numbers<[1], [0], [0], [1], [0, 0, 1, 1], [], []>} : vector<128x64xbf16>, vector<64x128xbf16>, vector<128x128xf32> -> vector<128x128xf32>
    %c0_4 = arith.constant 0 : index
    %c0_5 = arith.constant 0 : index
    %8 = vector.load %arg4[%c0_4, %c0_5] : memref<1x128xf32, #tpu.memory_space<vmem>>, vector<1x128xf32>
    %9 = vector.broadcast %8 : vector<1x128xf32> to vector<128x128xf32>
    %10 = arith.addf %7, %9 : vector<128x128xf32>
    %11 = arith.mulf %10, %10 : vector<128x128xf32>
    %12 = arith.mulf %10, %11 : vector<128x128xf32>
    %cst_6 = arith.constant 4.471500e-02 : f32
    %13 = vector.broadcast %cst_6 : f32 to vector<128x128xf32>
    %14 = arith.mulf %13, %12 : vector<128x128xf32>
    %15 = arith.addf %10, %14 : vector<128x128xf32>
    %cst_7 = arith.constant 0.797884583 : f32
    %16 = vector.broadcast %cst_7 : f32 to vector<128x128xf32>
    %17 = arith.mulf %16, %15 : vector<128x128xf32>
    %18 = math.tanh %17 : vector<128x128xf32>
    %cst_8 = arith.constant 1.000000e+00 : f32
    %19 = vector.broadcast %cst_8 : f32 to vector<128x128xf32>
    %20 = arith.addf %19, %18 : vector<128x128xf32>
    %cst_9 = arith.constant 5.000000e-01 : f32
    %21 = vector.broadcast %cst_9 : f32 to vector<128x128xf32>
    %22 = arith.mulf %21, %20 : vector<128x128xf32>
    %23 = arith.mulf %10, %22 : vector<128x128xf32>
    %24 = arith.truncf %23 : vector<128x128xf32> to vector<128x128xbf16>
    %c0_10 = arith.constant 0 : index
    %c0_11 = arith.constant 0 : index
    %25 = vector.load %arg5[%c0_10, %c0_11] : memref<128x128xf32, #tpu.memory_space<vmem>>, vector<128x128xf32>
    %26 = arith.truncf %25 : vector<128x128xf32> to vector<128x128xbf16>
    %cst_12 = arith.constant dense<0.000000e+00> : vector<128x128xf32>
    %27 = tpu.matmul %24, %26, %cst_12 {dimension_numbers = #tpu.dot_dimension_numbers<[1], [0], [0], [1], [0, 0, 1, 1], [], []>} : vector<128x128xbf16>, vector<128x128xbf16>, vector<128x128xf32> -> vector<128x128xf32>
    %c0_13 = arith.constant 0 : index
    %c0_14 = arith.constant 0 : index
    %28 = vector.load %arg7[%c0_13, %c0_14] : memref<128x128xf32, #tpu.memory_space<vmem>>, vector<128x128xf32>
    %29 = arith.addf %28, %27 : vector<128x128xf32>
    %c0_15 = arith.constant 0 : index
    %c0_16 = arith.constant 0 : index
    %30 = vector.load %arg7[%c0_15, %c0_16] : memref<128x128xf32, #tpu.memory_space<vmem>>, vector<128x128xf32>
    tpu.vector_store %arg7[%c0_15, %c0_16], %29 {strides = array<i32>} : memref<128x128xf32, #tpu.memory_space<vmem>>, vector<128x128xf32>,
    return
  }
  func.func @transform_0(%arg0: i32, %arg1: i32) -> (i32, i32) {
    %c0_i32 = arith.constant 0 : i32
    %c0_i32_0 = arith.constant 0 : i32
    return %arg0, %c0_i32 : i32, i32
  }
  func.func @transform_1(%arg0: i32, %arg1: i32) -> (i32, i32) {
    %c0_i32 = arith.constant 0 : i32
    %c0_i32_0 = arith.constant 0 : i32
    return %c0_i32, %arg1 : i32, i32
  }
  func.func @transform_2(%arg0: i32, %arg1: i32) -> (i32, i32) {
    %c0_i32 = arith.constant 0 : i32
    %c0_i32_0 = arith.constant 0 : i32
    return %c0_i32, %arg1 : i32, i32
  }
  func.func @transform_3(%arg0: i32, %arg1: i32) -> (i32, i32) {
    %c0_i32 = arith.constant 0 : i32
    %c0_i32_0 = arith.constant 0 : i32
    return %arg1, %c0_i32 : i32, i32
  }
  func.func @transform_4(%arg0: i32, %arg1: i32) -> (i32, i32) {
    %c0_i32 = arith.constant 0 : i32
    %c0_i32_0 = arith.constant 0 : i32
    %c0_i32_1 = arith.constant 0 : i32
    return %c0_i32, %c0_i32_0 : i32, i32
  }
  func.func @transform_5(%arg0: i32, %arg1: i32) -> (i32, i32) {
    %c0_i32 = arith.constant 0 : i32
    %c0_i32_0 = arith.constant 0 : i32
    return %arg0, %c0_i32 : i32, i32
  }
}

</mosaic_0001>

<bundles_post_ra>
// kernel: tpu_custom_call.1
= control target key start
LH: loop header
LB: loop body
LE: loop exit
PB: predicated region body
PF: predicated region fallthrough
CT: control target
= control target key end

     0   :  { %s1647_s0 = inlined_call_operand.vmem [shape: f32[200,64], index: 0, kind: input, shape index: {}]   ;;  %s1648_s1 = inlined_call_operand.hbm [shape: f32[64,256], index: 1, kind: input, shape index: {}]   ;;  %s1649_s2 = inlined_call_operand.vmem [shape: f32[1,256], index: 2, kind: input, shape index: {}]   ;;  %s1650_s3 = inlined_call_operand.vmem [shape: f32[256,128], index: 3, kind: input, shape index: {}]   ;;  %s1651_s4 = inlined_call_operand.vmem [shape: f32[1,128], index: 4, kind: input, shape index: {}]   ;;  %s1652_s5 = inlined_call_operand.hbm [shape: f32[200,128], index: 5, kind: output, shape index: {}]  }
   0x1   :  { %1660 = sst [smem:[#allocation16_spill]] %s1648_s1 }
   0x2   :  { %10 = vsyncpa [#allocation3], 0 }
   0x3   :  { %12 = vsyncpa [#allocation3 + $0x1], 0 }
   0x4   :  { %13 = vsyncpa [#allocation4], 0 }
   0x5   :  { %15 = vsyncpa [#allocation4 + $0x1], 0  ;;  %s1276_s18 = smov 0   ;;  %s1278_s19 = smov 0  }
   0x6   :  { %s1280_s20 = smov 0   ;;  %s1282_s21 = smov 0  }
   0x7   :  { %s1284_s22 = smov 0   ;;  %s1286_s23 = smov 0  }
   0x8   :  { %s1288_s24 = smov 0   ;;  %s1290_s25 = smov 0  }
   0x9   :  { %s1292_s26 = smov 0   ;;  %s1294_s27 = smov 0  }
   0xa   :  { %s1296_s28 = smov 0  }
   0xb LB: > { %1661 = sst [smem:[#allocation8_spill]] %s1214_s22  ;;  %s891_s29 = sadd.s32 4294967295, %s1238_s28   ;;  %s1238_s28 = sphi %s1296_s28, %s21_s28   ;;  %s1234_s27 = sphi %s1294_s27, %s1683_s27   ;;  %s1230_s26 = sphi %s1292_s26, %s1682_s26   ;;  %s1226_s25 = sphi %s1290_s25, %s1681_s25   ;;  %s1222_s24 = sphi %s1288_s24, %s1680_s24   ;;  %s1218_s23 = sphi %s1286_s23, %s1687_s23   ;;  %s1214_s22 = sphi %s1284_s22, %s1678_s22   ;;  %s1210_s21 = sphi %s1282_s21, %s1677_s21   ;;  %s1206_s20 = sphi %s1280_s20, %s1686_s20   ;;  %s1202_s19 = sphi %s1278_s19, %s1685_s19   ;;  %s1198_s18 = sphi %s1276_s18, %s1684_s18  }
   0xc   : > { %1662 = sst [smem:[#allocation9_spill]] %s1218_s23  ;;  %s892_s30 = sadd.s32 4294967294, %s1238_s28  }
   0xd   : > { %1663 = sst [smem:[#allocation10_spill]] %s1230_s26  ;;  %s30_s6 = sadd.s32 1, %s1230_s26 }
   0xe   : > { %1664 = sst [smem:[#allocation11_spill]] %s1234_s27  ;;  %s33_s7 = sadd.s32 1, %s1234_s27 }
   0xf   : > { %p31_p0 = scmp.ge.s32.totalorder %s30_s6, 2  ;;  %s66_s8 = sadd.s32 1, %s1218_s23 }
  0x10   : > { %p73_p1 = scmp.ne.s32.totalorder %s1218_s23, %s1214_s22  ;;  %p74_p2 = scmp.eq.s32.totalorder %s1238_s28, 0 }
  0x11   : > { %s1689_s6 = smov (%p31_p0, %s30_s6), 0  ;;  %s1691_s7 = smov (!%p31_p0, %s33_s7), %s1234_s27 }
  0x12   : > { %1665 = sst [smem:[#allocation12_spill]] %s1689_s6  ;;  %s63_s9 = ssub.s32 %s1230_s26, %s1689_s6 }
  0x13   : > { %p1342_p3 = por %p74_p2, %p73_p1  ;;  %p35_p4 = scmp.ge.s32.totalorder %s1691_s7, 2 }
  0x14   : > { %p64_p5 = scmp.eq.s32.totalorder %s63_s9, 0  ;;  %p79_p6 = scmp.ne.s32.totalorder %s1214_s22, %s1210_s21 }
  0x15   : > { %p80_p7 = scmp.eq.s32.totalorder %s891_s29, 0  ;;  %s1693_s7 = smov (%p35_p4, %s1691_s7), 0 }
  0x16   : > { %1667 = sst [smem:[#allocation13_spill]] %s1693_s7  ;;  %s162_s13 = ssub.s32 %s1234_s27, %s1693_s7 }
  0x17   : > { %s1350_s11 = scalar_select %p64_p5, %s1218_s23, %s66_s8  }
  0x18   : > { %p1352_p8 = por %p80_p7, %p79_p6  ;;  %p163_p9 = scmp.eq.s32.totalorder %s162_s13, 0 }
  0x19   : > { %1668 = sst [smem:[#allocation14_spill]] %s1350_s11  ;;  %s165_s14 = sadd.s32 1, %s1206_s20 }
  0x1a   : > { %p175_p10 = scmp.ne.s32.totalorder %s1206_s20, %s1202_s19  ;;  %p176_p11 = scmp.eq.s32.totalorder %s891_s29, 3 }
  0x1b   : > { %s1362_s15 = scalar_select %p163_p9, %s1206_s20, %s165_s14  }
  0x1c   : > { %p1364_p12 = por %p176_p11, %p175_p10  ;;  %p181_p13 = scmp.ne.s32.totalorder %s1202_s19, %s1198_s18 }
  0x1d   : > { %1670 = sst [smem:[#allocation15_spill]] %s1362_s15  ;;  %p182_p0 = scmp.eq.s32.totalorder %s892_s30, 3 }
  0x1e   : > { %p946_p1 = scmp.lt.s32.totalorder %s1238_s28, 4  ;;  %s222_s17 = sand.u32 1, %s1218_s23  }
  0x1f   : > { %p1372_p2 = por %p182_p0, %p181_p13  ;;  %s895_s8 = sshll.u32 %s222_s17, 6 }
  0x20   : > { %s896_s9 = sshll.u32 %s1230_s26, 3  ;;  %s1673_s1 = sld [smem:[#allocation16_spill]] }
  0x21   : > { %s226_s6 = scalar_lea.vmem [#allocation2], %s895_s8  ;;  %p939_p4 = pnand %p946_p1, %p1342_p3 }
  0x22   : > { %s233_s27 = sshll.u32 %s226_s6, 4  ;;  %p897_p5 = scmp.ge.s32.totalorder %s1238_s28, 1  ;;  %s234_s27 = int_to_ptr.vmem [resolvable:$true] %s233_s27 }
  0x23   : > { %s223_s30 = scalar_lea.sflag [#allocation3], %s222_s17  ;;  %s1240_s11 = smov 256  }
  0x24   : > { %s1241_s23 = smov 128   ;;  %s1242_s15 = smov 8  }
  0x25   : > { %p256_p6 = scmp.lt.s32.totalorder %s1238_s28, 5 }
  0x26   : > { %s230_s14 = scalar_lea.hbm %s1673_s1, %s896_s9 }
  0x27   : > { %s231_s7 = sshll.u32 %s230_s14, 4  ;;  %p257_p7 = pnand %p897_p5, %p256_p6  ;;  %s232_s7 = int_to_ptr.hbm [resolvable:$true] %s231_s7 }
  0x28   : > { %941 = dma.hbm_to_vmem [thread:$0]  (!%p939_p4), %s232_s7, 1024, %s234_s27, %s223_s30, %s1240_s11, %s1241_s23, %s1242_s15  }
  0x29   : > { %260 = sbr.rel (%p257_p7) target bundleno = 544 (0x220), region = 40  ;;  %s262_s29 = sand.u32 (!%p257_p7), 1, %s1214_s22  }
  0x2a   : > { %s898_s9 = sshll.u32 (!%p257_p7), %s262_s29, 6  ;;  %s263_s13 = scalar_lea.sflag (!%p257_p7), [#allocation3], %s262_s29 }
  0x2b   : > { %s1385_s8 = scalar_lea.vmem (!%p257_p7), [#allocation2], %s898_s9 }
  0x2e   : > { %1189 = dma.done.wait (%p1352_p8), %s263_s13, 1024  }
  0x2f   : > { %1191 = vsyncadd (%p1352_p8), %s263_s13, 4294966272  ;;  %s1657_s23 = sand.u32 1, %s1202_s19   ;;  %s1393_s27 = sshll.u32 %s1226_s25, 4 }
  0x30   : > { %s899_s6 = sshll.u32 %s1657_s23, 7  ;;  %p316_p3 = scmp.lt.s32.totalorder %s1393_s27, 24 }
  0x31   : > { %p325_p9 = scmp.lt.s32.totalorder %s1222_s24, 1  ;;  %s902_s12 = sshll.u32 %s1222_s24, 4 }
  0x32   : > { %s317_s7 = scalar_select %p316_p3, %s1393_s27, 24 }
  0x33   : > { %s1401_s10 = scalar_select %p325_p9, %s1222_s24, 1 }
  0x34   : > { %s901_s11 = sshll.u32 %s317_s7, 3  ;;  %p329_p8 = scmp.lt.s32.totalorder %s902_s12, 31 }
  0x35   : > { %s1407_s14 = scalar_lea.vmem %s1647_s0, %s901_s11  ;;  %s327_s9 = scalar_lea.vmem %s1649_s2, %s1401_s10 }
  0x36   : > { %s1695_s12 = smov (!%p329_p8, %s902_s12), 31  ;;  %s1418_s22 = scalar_lea.vmem [#allocation5], %s899_s6 }
  0x37   : > { %s903_s13 = sshll.u32 %s1695_s12, 3  ;;  %p904_p10 = scmp.ne.s32.totalorder %s1222_s24, 0 }
  0x38   : > { %s1416_s26 = scalar_lea.vmem %s1650_s3, %s903_s13 }
  0x39   : > { %343 = sbr.rel (%p904_p10) target bundleno = 79 (0x4f), region = 48 }
  0x3e   : > { %v1041_v0 = vld [vmem:[%s1651_s4] ss:$0 sm:$0xff] }
  0x3f   : > { %348 = vst [vmem:[%s1418_s22] sm:$0xff] %v1041_v0 }
  0x40   : > { %349 = vst [vmem:[%s1418_s22 + $0x8] sm:$0xff] %v1041_v0 }
  0x41   : > { %350 = vst [vmem:[%s1418_s22 + $0x10] sm:$0xff] %v1041_v0 }
  0x42   : > { %351 = vst [vmem:[%s1418_s22 + $0x18] sm:$0xff] %v1041_v0 }
  0x43   : > { %352 = vst [vmem:[%s1418_s22 + $0x20] sm:$0xff] %v1041_v0 }
  0x44   : > { %353 = vst [vmem:[%s1418_s22 + $0x28] sm:$0xff] %v1041_v0 }
  0x45   : > { %354 = vst [vmem:[%s1418_s22 + $0x30] sm:$0xff] %v1041_v0 }
  0x46   : > { %355 = vst [vmem:[%s1418_s22 + $0x38] sm:$0xff] %v1041_v0 }
  0x47   : > { %356 = vst [vmem:[%s1418_s22 + $0x40] sm:$0xff] %v1041_v0 }
  0x48   : > { %357 = vst [vmem:[%s1418_s22 + $0x48] sm:$0xff] %v1041_v0 }
  0x49   : > { %358 = vst [vmem:[%s1418_s22 + $0x50] sm:$0xff] %v1041_v0 }
  0x4a   : > { %359 = vst [vmem:[%s1418_s22 + $0x58] sm:$0xff] %v1041_v0 }
  0x4b   : > { %360 = vst [vmem:[%s1418_s22 + $0x60] sm:$0xff] %v1041_v0 }
  0x4c   : > { %361 = vst [vmem:[%s1418_s22 + $0x68] sm:$0xff] %v1041_v0 }
  0x4d   : > { %362 = vst [vmem:[%s1418_s22 + $0x70] sm:$0xff] %v1041_v0 }
  0x4e   : > { %363 = vst [vmem:[%s1418_s22 + $0x78] sm:$0xff] %v1041_v0 }
  0x4f PF: > { %v394_v1 = vld [vmem:[%s1385_s8 + $0x30] sm:$0xff]  ;;  %v395_v2 = vld [vmem:[%s1385_s8 + $0x38] sm:$0xff]  ;;  %v392_v3 = vld [vmem:[%s1385_s8 + $0x20] sm:$0xff]  ;;  %vm404_vm0 = vcmask 523264   ;;  %s760_s23 = ssub.s32 (%p1364_p12), 25, %s1393_s27 }
  0x50   : > { %v399_v4 = vpack.c.bf16 %v395_v2, %v394_v1  ;;  %v393_v5 = vld [vmem:[%s1385_s8 + $0x28] sm:$0xff]  ;;  %v390_v7 = vld [vmem:[%s1385_s8 + $0x10] sm:$0xff]  ;;  %v391_v8 = vld [vmem:[%s1385_s8 + $0x18] sm:$0xff]  ;;  %p761_p11 = scmp.lt.s32.totalorder (%p1364_p12), %s760_s23, 16 }
  0x51   : > { %v398_v6 = vpack.c.bf16 %v393_v5, %v392_v3  ;;  %v397_v9 = vpack.c.bf16 %v391_v8, %v390_v7  ;;  %v388_v10 = vld [vmem:[%s1385_s8] sm:$0xff]  ;;  %v389_v11 = vld [vmem:[%s1385_s8 + $0x8] sm:$0xff]  ;;  %v374_v16 = vld [vmem:[%s1407_s14 + $0x50] sm:$0xff] }
  0x52   : > { %433 = vmatpush.bf16.msra.mxu0 %v399_v4  ;;  %923 = vmatpush.bf16.msra.mxu3 %v399_v4  ;;  %v396_v12 = vpack.c.bf16 %v389_v11, %v388_v10  ;;  %v364_v13 = vld [vmem:[%s1407_s14] sm:$0xff]  ;;  %v365_v14 = vld [vmem:[%s1407_s14 + $0x8] sm:$0xff]  ;;  %v375_v17 = vld [vmem:[%s1407_s14 + $0x58] sm:$0xff] }
  0x53   : > { %v380_v15 = vpack.c.bf16 %v365_v14, %v364_v13  ;;  %v385_v18 = vpack.c.bf16 %v375_v17, %v374_v16  ;;  %v366_v19 = vld [vmem:[%s1407_s14 + $0x10] sm:$0xff]  ;;  %v367_v20 = vld [vmem:[%s1407_s14 + $0x18] sm:$0xff]  ;;  %v376_v22 = vld [vmem:[%s1407_s14 + $0x60] sm:$0xff] }
  0x54   : > { %v381_v21 = vpack.c.bf16 %v367_v20, %v366_v19  ;;  %v377_v23 = vld [vmem:[%s1407_s14 + $0x68] sm:$0xff]  ;;  %v368_v25 = vld [vmem:[%s1407_s14 + $0x20] sm:$0xff]  ;;  %v378_v28 = vld [vmem:[%s1407_s14 + $0x70] sm:$0xff] }
  0x55   : > { %v386_v24 = vpack.c.bf16 %v377_v23, %v376_v22  ;;  %v369_v26 = vld [vmem:[%s1407_s14 + $0x28] sm:$0xff]  ;;  %v379_v29 = vld [vmem:[%s1407_s14 + $0x78] sm:$0xff]  ;;  %v370_v31 = vld [vmem:[%s1407_s14 + $0x30] sm:$0xff] }
  0x56   : > { %434 = vmatpush.bf16.msra.mxu0 %v398_v6  ;;  %924 = vmatpush.bf16.msra.mxu3 %v398_v6  ;;  %v382_v27 = vpack.c.bf16 %v369_v26, %v368_v25  ;;  %v387_v30 = vpack.c.bf16 %v379_v29, %v378_v28  ;;  %v371_v32 = vld [vmem:[%s1407_s14 + $0x38] sm:$0xff]  ;;  %v372_v34 = vld [vmem:[%s1407_s14 + $0x40] sm:$0xff]  ;;  %v373_v35 = vld [vmem:[%s1407_s14 + $0x48] sm:$0xff] }
  0x57   : > { %v383_v33 = vpack.c.bf16 %v371_v32, %v370_v31  ;;  %v384_v36 = vpack.c.bf16 %v373_v35, %v372_v34  ;;  %v644_v37 = vld [vmem:[%s1416_s26 + $0x70] sm:$0xff]  ;;  %v645_v38 = vld [vmem:[%s1416_s26 + $0x78] sm:$0xff]  ;;  %v642_v40 = vld [vmem:[%s1416_s26 + $0x60] sm:$0xff] }
  0x58   : > { %v653_v39 = vpack.c.bf16 %v645_v38, %v644_v37  ;;  %v643_v41 = vld [vmem:[%s1416_s26 + $0x68] sm:$0xff]  ;;  %v640_v43 = vld [vmem:[%s1416_s26 + $0x50] sm:$0xff]  ;;  %v641_v44 = vld [vmem:[%s1416_s26 + $0x58] sm:$0xff] }
  0x59   : > { %v652_v42 = vpack.c.bf16 %v643_v41, %v642_v40  ;;  %v651_v45 = vpack.c.bf16 %v641_v44, %v640_v43  ;;  %v638_v46 = vld [vmem:[%s1416_s26 + $0x40] sm:$0xff]  ;;  %v639_v47 = vld [vmem:[%s1416_s26 + $0x48] sm:$0xff]  ;;  %v636_v49 = vld [vmem:[%s1416_s26 + $0x30] sm:$0xff] }
  0x5a   : > { %435 = vmatpush.bf16.msra.mxu0 %v397_v9  ;;  %925 = vmatpush.bf16.msra.mxu3 %v397_v9  ;;  %v650_v48 = vpack.c.bf16 %v639_v47, %v638_v46  ;;  %v637_v50 = vld [vmem:[%s1416_s26 + $0x38] sm:$0xff]  ;;  %v634_v52 = vld [vmem:[%s1416_s26 + $0x20] sm:$0xff]  ;;  %v635_v53 = vld [vmem:[%s1416_s26 + $0x28] sm:$0xff] }
  0x5b   : > { %654 = vmatpush.bf16.msra.mxu1 %v653_v39  ;;  %927 = vmatpush.bf16.msra.mxu2 %v653_v39  ;;  %v649_v51 = vpack.c.bf16 %v637_v50, %v636_v49  ;;  %v648_v54 = vpack.c.bf16 %v635_v53, %v634_v52  ;;  %v632_v55 = vld [vmem:[%s1416_s26 + $0x10] sm:$0xff]  ;;  %v633_v56 = vld [vmem:[%s1416_s26 + $0x18] sm:$0xff]  ;;  %v1491_v58 = vld [vmem:[%s327_s9] ss:$0 sm:$0xff] }
  0x5c   : > { %v647_v57 = vpack.c.bf16 %v633_v56, %v632_v55  ;;  %v630_v59 = vld [vmem:[%s1416_s26] sm:$0xff]  ;;  %v631_v60 = vld [vmem:[%s1416_s26 + $0x8] sm:$0xff]  ;;  %s1674_s26 = sand.u32 1, %s1202_s19  }
  0x5d   : > { %v646_v61 = vpack.c.bf16 %v631_v60, %v630_v59  ;;  %s1566_s8 = scalar_lea.sflag [#allocation4], %s1674_s26 }
  0x5e   : > { %436 = vmatpush.bf16.msra.mxu0 %v396_v12  ;;  %926 = vmatpush.bf16.msra.mxu3 %v396_v12 }
  0x5f   : > { %655 = vmatpush.bf16.msra.mxu1 %v652_v42  ;;  %928 = vmatpush.bf16.msra.mxu2 %v652_v42 }
  0x61   : > { %905 = vmatmul.msk.bf16.vlgmr.msra.gmra.mxu0 %vm404_vm0, %v380_v15  ;;  %910 = vmatmul.msk.bf16.vlgmr.msra.gmra.mxu3 %vm404_vm0, %v385_v18 }
  0x63   : > { %656 = vmatpush.bf16.msra.mxu1 %v651_v45  ;;  %929 = vmatpush.bf16.msra.mxu2 %v651_v45 }
  0x67   : > { %657 = vmatpush.bf16.msra.mxu1 %v650_v48  ;;  %930 = vmatpush.bf16.msra.mxu2 %v650_v48 }
  0x6b   : > { %658 = vmatpush.bf16.msra.mxu1 %v649_v51  ;;  %931 = vmatpush.bf16.msra.mxu2 %v649_v51 }
  0x6f   : > { %659 = vmatpush.bf16.msra.mxu1 %v648_v54  ;;  %932 = vmatpush.bf16.msra.mxu2 %v648_v54 }
  0x71   : > { %906 = vmatmul.msk.bf16.gmra.mxu0 %vm404_vm0, %v381_v21  ;;  %911 = vmatmul.msk.bf16.gmra.mxu3 %vm404_vm0, %v386_v24 }
  0x73   : > { %660 = vmatpush.bf16.msra.mxu1 %v647_v57  ;;  %933 = vmatpush.bf16.msra.mxu2 %v647_v57 }
  0x77   : > { %661 = vmatpush.bf16.msra.mxu1 %v646_v61  ;;  %934 = vmatpush.bf16.msra.mxu2 %v646_v61 }
  0x81   : > { %907 = vmatmul.msk.bf16.gmra.mxu0 %vm404_vm0, %v382_v27  ;;  %912 = vmatmul.msk.bf16.gmra.mxu3 %vm404_vm0, %v387_v30 }
  0x91   : > { %908 = vmatmul.msk.bf16.gmra.mxu0 %vm404_vm0, %v383_v33 }
  0xa1   : > { %909 = vmatmul.msk.bf16.gmra.mxu0 %vm404_vm0, %v384_v36 }
  0xde   : > { %v438_v62 = vpop.f32.mrf.mxu0 }
  0xdf   : > { %v439_v63 = vadd.f32 %v1491_v58, %v438_v62 }
  0xe1   : > { %v478_v0 = vmul.f32 %v439_v63, %v439_v63 }
  0xe3   : > { %v494_v1 = vmul.f32 %v478_v0, %v439_v63 }
  0xe4   : > { %v463_v54 = vpop.f32.mrf.mxu3 }
  0xe5   : > { %v510_v2 = vmul.f32 0.044715, %v494_v1 }
  0xe6   : > { %v440_v3 = vpop.f32.mrf.mxu0 }
  0xe7   : > { %v526_v4 = vadd.f32 %v510_v2, %v439_v63  ;;  %v441_v5 = vadd.f32 %v1491_v58, %v440_v3 }
  0xe9   : > { %v479_v6 = vmul.f32 %v441_v5, %v441_v5  ;;  %v542_v7 = vmul.f32 0.7978846, %v526_v4 }
  0xeb   : > { %v495_v8 = vmul.f32 %v479_v6, %v441_v5  ;;  %1043 = vtanh.f32 %v542_v7 }
  0xec   : > { %v465_v6 = vpop.f32.mrf.mxu3 }
  0xed   : > { %v511_v9 = vmul.f32 0.044715, %v495_v8 }
  0xee   : > { %v443_v10 = vpop.f32.mrf.mxu0 }
  0xef   : > { %v527_v11 = vadd.f32 %v511_v9, %v441_v5  ;;  %v444_v12 = vadd.f32 %v1491_v58, %v443_v10 }
  0xf1   : > { %v480_v13 = vmul.f32 %v444_v12, %v444_v12  ;;  %v543_v14 = vmul.f32 0.7978846, %v527_v11  ;;  %v1044_v15 = vpop.eup %1043 }
  0xf2   : > { %v574_v19 = vadd.f32 1.0, %v1044_v15 }
  0xf3   : > { %v496_v16 = vmul.f32 %v480_v13, %v444_v12  ;;  %1045 = vtanh.f32 %v543_v14 }
  0xf4   : > { %v590_v26 = vmul.f32 0.5, %v574_v19 }
  0xf5   : > { %v512_v17 = vmul.f32 0.044715, %v496_v16 }
  0xf6   : > { %v445_v18 = vpop.f32.mrf.mxu0  ;;  %v606_v31 = vmul.f32 %v590_v26, %v439_v63  ;;  %v1508_v26 = vadd.f32 %v1491_v58, %v465_v6 }
  0xf7   : > { %v528_v20 = vadd.f32 %v512_v17, %v444_v12  ;;  %v446_v21 = vadd.f32 %v1491_v58, %v445_v18 }
  0xf9   : > { %v1046_v22 = vpop.eup %1045  ;;  %v481_v23 = vmul.f32 %v446_v21, %v446_v21  ;;  %v544_v24 = vmul.f32 0.7978846, %v528_v20 }
  0xfa   : > { %v575_v25 = vadd.f32 1.0, %v1046_v22 }
  0xfb   : > { %v497_v27 = vmul.f32 %v481_v23, %v446_v21  ;;  %1047 = vtanh.f32 %v544_v24  ;;  %v1505_v23 = vadd.f32 %v1491_v58, %v463_v54  ;;  %v468_v24 = vpop.f32.mrf.mxu3 }
  0xfc   : > { %v591_v28 = vmul.f32 0.5, %v575_v25  ;;  %v1519_v54 = vadd.f32 %v1491_v58, %v468_v24 }
  0xfd   : > { %v513_v29 = vmul.f32 0.044715, %v497_v27 }
  0xfe   : > { %v448_v30 = vpop.f32.mrf.mxu0  ;;  %v607_v32 = vmul.f32 %v591_v28, %v441_v5 }
  0xff   : > { %v529_v33 = vadd.f32 %v513_v29, %v446_v21  ;;  %v449_v34 = vadd.f32 %v1491_v58, %v448_v30  ;;  %v488_v29 = vmul.f32 %v1505_v23, %v1505_v23 }
 0x100   : > { %v622_v35 = vpack.c.bf16 %v607_v32, %v606_v31  ;;  %v489_v32 = vmul.f32 %v1508_v26, %v1508_v26 }
 0x101   : > { %v482_v36 = vmul.f32 %v449_v34, %v449_v34  ;;  %v545_v37 = vmul.f32 0.7978846, %v529_v33  ;;  %v1048_v38 = vpop.eup %1047 }
 0x102   : > { %662 = vmatmul.bf16.vlgmr.msra.gmra.mxu1 %v622_v35  ;;  %v576_v42 = vadd.f32 1.0, %v1048_v38  ;;  %v504_v38 = vmul.f32 %v488_v29, %v1505_v23 }
 0x103   : > { %v498_v39 = vmul.f32 %v482_v36, %v449_v34  ;;  %1049 = vtanh.f32 %v545_v37 }
 0x104   : > { %v592_v49 = vmul.f32 0.5, %v576_v42 }
 0x105   : > { %v514_v40 = vmul.f32 0.044715, %v498_v39 }
 0x106   : > { %v450_v41 = vpop.f32.mrf.mxu0  ;;  %v608_v55 = vmul.f32 %v592_v49, %v444_v12 }
 0x107   : > { %v530_v43 = vadd.f32 %v514_v40, %v449_v34  ;;  %v451_v44 = vadd.f32 %v1491_v58, %v450_v41  ;;  %v505_v41 = vmul.f32 %v489_v32, %v1508_v26 }
 0x109   : > { %v1050_v45 = vpop.eup %1049  ;;  %v483_v46 = vmul.f32 %v451_v44, %v451_v44  ;;  %v546_v47 = vmul.f32 0.7978846, %v530_v43  ;;  %v470_v43 = vpop.f32.mrf.mxu3  ;;  %v521_v49 = vmul.f32 0.044715, %v505_v41 }
 0x10a   : > { %v577_v48 = vadd.f32 1.0, %v1050_v45 }
 0x10b   : > { %v499_v50 = vmul.f32 %v483_v46, %v451_v44  ;;  %1051 = vtanh.f32 %v546_v47  ;;  %v520_v46 = vmul.f32 0.044715, %v504_v38 }
 0x10c   : > { %v593_v51 = vmul.f32 0.5, %v577_v48 }
 0x10d   : > { %v515_v52 = vmul.f32 0.044715, %v499_v50 }
 0x10e   : > { %v453_v53 = vpop.f32.mrf.mxu0  ;;  %v609_v56 = vmul.f32 %v593_v51, %v446_v21 }
 0x10f   : > { %v531_v57 = vadd.f32 %v515_v52, %v451_v44  ;;  %v454_v59 = vadd.f32 %v1491_v58, %v453_v53  ;;  %v536_v53 = vadd.f32 %v520_v46, %v1505_v23 }
 0x110   : > { %v623_v60 = vpack.c.bf16 %v609_v56, %v608_v55  ;;  %v537_v56 = vadd.f32 %v521_v49, %v1508_v26 }
 0x111   : > { %v484_v61 = vmul.f32 %v454_v59, %v454_v59  ;;  %v547_v62 = vmul.f32 0.7978846, %v531_v57  ;;  %v1052_v63 = vpop.eup %1051  ;;  %v471_v57 = vadd.f32 %v1491_v58, %v470_v43 }
 0x112   : > { %667 = vmatmul.bf16.gmra.mxu1 %v623_v60  ;;  %v578_v3 = vadd.f32 1.0, %v1052_v63  ;;  %v473_v60 = vpop.f32.mrf.mxu3 }
 0x113   : > { %v500_v0 = vmul.f32 %v484_v61, %v454_v59  ;;  %1053 = vtanh.f32 %v547_v62  ;;  %v552_v62 = vmul.f32 0.7978846, %v536_v53  ;;  %v491_v63 = vmul.f32 %v471_v57, %v471_v57 }
 0x114   : > { %v594_v11 = vmul.f32 0.5, %v578_v3 }
 0x115   : > { %v516_v1 = vmul.f32 0.044715, %v500_v0  ;;  %v553_v0 = vmul.f32 0.7978846, %v537_v56 }
 0x116   : > { %v455_v2 = vpop.f32.mrf.mxu0  ;;  %v610_v16 = vmul.f32 %v594_v11, %v449_v34 }
 0x117   : > { %v532_v4 = vadd.f32 %v516_v1, %v454_v59  ;;  %v456_v5 = vadd.f32 %v1491_v58, %v455_v2 }
 0x119   : > { %v1054_v7 = vpop.eup %1053  ;;  %v485_v8 = vmul.f32 %v456_v5, %v456_v5  ;;  %v548_v9 = vmul.f32 0.7978846, %v532_v4 }
 0x11a   : > { %v579_v10 = vadd.f32 1.0, %v1054_v7 }
 0x11b   : > { %v501_v12 = vmul.f32 %v485_v8, %v456_v5  ;;  %1055 = vtanh.f32 %v548_v9 }
 0x11c   : > { %v595_v13 = vmul.f32 0.5, %v579_v10 }
 0x11d   : > { %v517_v14 = vmul.f32 0.044715, %v501_v12  ;;  %v475_v12 = vpop.f32.mrf.mxu3 }
 0x11e   : > { %v458_v15 = vpop.f32.mrf.mxu0  ;;  %v611_v17 = vmul.f32 %v595_v13, %v451_v44 }
 0x11f   : > { %v533_v18 = vadd.f32 %v517_v14, %v456_v5  ;;  %v459_v19 = vadd.f32 %v1491_v58, %v458_v15 }
 0x120   : > { %v624_v20 = vpack.c.bf16 %v611_v17, %v610_v16  ;;  %v474_v16 = vadd.f32 %v1491_v58, %v473_v60 }
 0x121   : > { %v486_v21 = vmul.f32 %v459_v19, %v459_v19  ;;  %v549_v22 = vmul.f32 0.7978846, %v533_v18  ;;  %v1056_v25 = vpop.eup %1055  ;;  %v476_v18 = vadd.f32 %v1491_v58, %v475_v12 }
 0x122   : > { %672 = vmatmul.bf16.gmra.mxu1 %v624_v20  ;;  %v580_v31 = vadd.f32 1.0, %v1056_v25 }
 0x123   : > { %v502_v27 = vmul.f32 %v486_v21, %v459_v19  ;;  %1057 = vtanh.f32 %v549_v22  ;;  %v492_v22 = vmul.f32 %v474_v16, %v474_v16  ;;  %v493_v25 = vmul.f32 %v476_v18, %v476_v18 }
 0x124   : > { %v596_v40 = vmul.f32 0.5, %v580_v31 }
 0x125   : > { %v518_v28 = vmul.f32 0.044715, %v502_v27  ;;  %v508_v29 = vmul.f32 %v492_v22, %v474_v16 }
 0x126   : > { %v460_v30 = vpop.f32.mrf.mxu0  ;;  %v612_v47 = vmul.f32 %v596_v40, %v454_v59  ;;  %v490_v59 = vmul.f32 %v1519_v54, %v1519_v54 }
 0x127   : > { %v534_v33 = vadd.f32 %v518_v28, %v459_v19  ;;  %v461_v34 = vadd.f32 %v1491_v58, %v460_v30  ;;  %v509_v30 = vmul.f32 %v493_v25, %v476_v18 }
 0x128   : > { %v506_v2 = vmul.f32 %v490_v59, %v1519_v54  ;;  %v704_v59 = vld [vmem:[%s1418_s22 + $0x8] sm:$0xff] }
 0x129   : > { %v1058_v35 = vpop.eup %1057  ;;  %v487_v36 = vmul.f32 %v461_v34, %v461_v34  ;;  %v550_v37 = vmul.f32 0.7978846, %v534_v33  ;;  %v524_v33 = vmul.f32 0.044715, %v508_v29 }
 0x12a   : > { %v581_v39 = vadd.f32 1.0, %v1058_v35  ;;  %v522_v7 = vmul.f32 0.044715, %v506_v2 }
 0x12b   : > { %v503_v42 = vmul.f32 %v487_v36, %v461_v34  ;;  %1059 = vtanh.f32 %v550_v37  ;;  %v540_v37 = vadd.f32 %v524_v33, %v474_v16  ;;  %v716_v33 = vld [vmem:[%s1418_s22 + $0x68] sm:$0xff] }
 0x12c   : > { %v597_v44 = vmul.f32 0.5, %v581_v39  ;;  %v538_v15 = vadd.f32 %v522_v7, %v1519_v54  ;;  %v708_v7 = vld [vmem:[%s1418_s22 + $0x28] sm:$0xff] }
 0x12d   : > { %v519_v45 = vmul.f32 0.044715, %v503_v42  ;;  %v556_v41 = vmul.f32 0.7978846, %v540_v37 }
 0x12e   : > { %v613_v48 = vmul.f32 %v597_v44, %v456_v5  ;;  %v507_v5 = vmul.f32 %v491_v63, %v471_v57  ;;  %v554_v24 = vmul.f32 0.7978846, %v538_v15 }
 0x12f   : > { %v535_v50 = vadd.f32 %v519_v45, %v461_v34 }
 0x130   : > { %v625_v51 = vpack.c.bf16 %v613_v48, %v612_v47  ;;  %v523_v10 = vmul.f32 0.044715, %v507_v5 }
 0x131   : > { %v551_v52 = vmul.f32 0.7978846, %v535_v50  ;;  %v1060_v55 = vpop.eup %1059 }
 0x132   : > { %677 = vmatmul.bf16.gmra.mxu1 %v625_v51  ;;  %v582_v61 = vadd.f32 1.0, %v1060_v55  ;;  %v539_v17 = vadd.f32 %v523_v10, %v471_v57  ;;  %v709_v10 = vld [vmem:[%s1418_s22 + $0x30] sm:$0xff] }
 0x133   : > { %1061 = vtanh.f32 %v551_v52 }
 0x134   : > { %v598_v4 = vmul.f32 0.5, %v582_v61  ;;  %1063 = vtanh.f32 %v552_v62  ;;  %v705_v62 = vld [vmem:[%s1418_s22 + $0x10] sm:$0xff] }
 0x135   : > { %1065 = vtanh.f32 %v553_v0 }
 0x136   : > { %v614_v8 = vmul.f32 %v598_v4, %v459_v19  ;;  %v555_v19 = vmul.f32 0.7978846, %v539_v17  ;;  %1067 = vtanh.f32 %v554_v24  ;;  %v707_v4 = vld [vmem:[%s1418_s22 + $0x20] sm:$0xff]  ;;  %v713_v24 = vld [vmem:[%s1418_s22 + $0x50] sm:$0xff] }
 0x138   : > { %1069 = vtanh.f32 %v555_v19 }
 0x139   : > { %v1062_v1 = vpop.eup %1061  ;;  %1071 = vtanh.f32 %v556_v41 }
 0x13a   : > { %v583_v3 = vadd.f32 1.0, %v1062_v1  ;;  %v1064_v11 = vpop.eup %1063  ;;  %v706_v1 = vld [vmem:[%s1418_s22 + $0x18] sm:$0xff] }
 0x13b   : > { %v1066_v14 = vpop.eup %1065  ;;  %v584_v20 = vadd.f32 1.0, %v1064_v11 }
 0x13c   : > { %v599_v6 = vmul.f32 0.5, %v583_v3  ;;  %v585_v21 = vadd.f32 1.0, %v1066_v14  ;;  %v1068_v35 = vpop.eup %1067 }
 0x13d   : > { %v600_v27 = vmul.f32 0.5, %v584_v20  ;;  %v586_v39 = vadd.f32 1.0, %v1068_v35  ;;  %v712_v20 = vld [vmem:[%s1418_s22 + $0x48] sm:$0xff] }
 0x13e   : > { %v615_v9 = vmul.f32 %v599_v6, %v461_v34  ;;  %v601_v28 = vmul.f32 0.5, %v585_v21  ;;  %v525_v34 = vmul.f32 0.044715, %v509_v30  ;;  %v1070_v36 = vpop.eup %1069  ;;  %v715_v30 = vld [vmem:[%s1418_s22 + $0x60] sm:$0xff] }
 0x13f   : > { %v616_v31 = vmul.f32 %v600_v27, %v1505_v23  ;;  %v587_v40 = vadd.f32 1.0, %v1070_v36  ;;  %v602_v43 = vmul.f32 0.5, %v586_v39  ;;  %v1072_v45 = vpop.eup %1071  ;;  %v714_v27 = vld [vmem:[%s1418_s22 + $0x58] sm:$0xff] }
 0x140   : > { %v626_v13 = vpack.c.bf16 %v615_v9, %v614_v8  ;;  %v617_v32 = vmul.f32 %v601_v28, %v1508_v26  ;;  %v541_v38 = vadd.f32 %v525_v34, %v476_v18  ;;  %v588_v48 = vadd.f32 1.0, %v1072_v45 }
 0x141   : > { %v603_v44 = vmul.f32 0.5, %v587_v40  ;;  %v618_v23 = vmul.f32 %v602_v43, %v1519_v54  ;;  %v703_v54 = vld [vmem:[%s1418_s22] sm:$0xff] }
 0x142   : > { %682 = vmatmul.bf16.vlgmr.msra.gmra.mxu2 %v626_v13  ;;  %v627_v58 = vpack.c.bf16 %v617_v32, %v616_v31  ;;  %v557_v42 = vmul.f32 0.7978846, %v541_v38  ;;  %v604_v50 = vmul.f32 0.5, %v588_v48  ;;  %v710_v13 = vld [vmem:[%s1418_s22 + $0x38] sm:$0xff] }
 0x143   : > { %v619_v26 = vmul.f32 %v603_v44, %v471_v57  ;;  %v718_v38 = vld [vmem:[%s1418_s22 + $0x78] sm:$0xff] }
 0x144   : > { %1073 = vtanh.f32 %v557_v42  ;;  %v620_v52 = vmul.f32 %v604_v50, %v474_v16  ;;  %v711_v16 = vld [vmem:[%s1418_s22 + $0x40] sm:$0xff] }
 0x145   : > { %v628_v46 = vpack.c.bf16 %v619_v26, %v618_v23 }
 0x14a   : > { %v1074_v47 = vpop.eup %1073 }
 0x14b   : > { %v589_v49 = vadd.f32 1.0, %v1074_v47 }
 0x14d   : > { %v605_v51 = vmul.f32 0.5, %v589_v49 }
 0x14f   : > { %v621_v53 = vmul.f32 %v605_v51, %v476_v18 }
 0x151   : > { %v629_v55 = vpack.c.bf16 %v621_v53, %v620_v52 }
 0x152   : > { %687 = vmatmul.bf16.gmra.mxu2 %v627_v58  ;;  %v717_v58 = vld [vmem:[%s1418_s22 + $0x70] sm:$0xff] }
 0x162   : > { %692 = vmatmul.bf16.gmra.mxu2 %v628_v46 }
 0x172   : > { %697 = vmatmul.bf16.gmra.mxu2 %v629_v55 }
 0x17f   : > { %v663_v56 = vpop.f32.mrf.mxu1 }
 0x180   : > { %v719_v57 = vadd.f32 %v703_v54, %v663_v56 }
 0x182   : > { %735 = vst [vmem:[%s1418_s22] sm:$0xff] %v719_v57 }
 0x187   : > { %v665_v60 = vpop.f32.mrf.mxu1 }
 0x188   : > { %v720_v61 = vadd.f32 %v704_v59, %v665_v60 }
 0x18a   : > { %736 = vst [vmem:[%s1418_s22 + $0x8] sm:$0xff] %v720_v61 }
 0x18f   : > { %v668_v63 = vpop.f32.mrf.mxu1 }
 0x190   : > { %v721_v0 = vadd.f32 %v705_v62, %v668_v63 }
 0x192   : > { %737 = vst [vmem:[%s1418_s22 + $0x10] sm:$0xff] %v721_v0 }
 0x197   : > { %v670_v2 = vpop.f32.mrf.mxu1 }
 0x198   : > { %v722_v3 = vadd.f32 %v706_v1, %v670_v2 }
 0x19a   : > { %738 = vst [vmem:[%s1418_s22 + $0x18] sm:$0xff] %v722_v3 }
 0x19f   : > { %v673_v5 = vpop.f32.mrf.mxu1 }
 0x1a0   : > { %v723_v6 = vadd.f32 %v707_v4, %v673_v5 }
 0x1a2   : > { %739 = vst [vmem:[%s1418_s22 + $0x20] sm:$0xff] %v723_v6 }
 0x1a7   : > { %v675_v8 = vpop.f32.mrf.mxu1 }
 0x1a8   : > { %v724_v9 = vadd.f32 %v708_v7, %v675_v8 }
 0x1aa   : > { %740 = vst [vmem:[%s1418_s22 + $0x28] sm:$0xff] %v724_v9 }
 0x1af   : > { %v678_v11 = vpop.f32.mrf.mxu1 }
 0x1b0   : > { %v725_v12 = vadd.f32 %v709_v10, %v678_v11 }
 0x1b2   : > { %741 = vst [vmem:[%s1418_s22 + $0x30] sm:$0xff] %v725_v12 }
 0x1b7   : > { %v680_v14 = vpop.f32.mrf.mxu1 }
 0x1b8   : > { %v726_v15 = vadd.f32 %v710_v13, %v680_v14 }
 0x1ba   : > { %742 = vst [vmem:[%s1418_s22 + $0x38] sm:$0xff] %v726_v15 }
 0x1c5   : > { %v683_v17 = vpop.f32.mrf.mxu2 }
 0x1c6   : > { %v727_v18 = vadd.f32 %v711_v16, %v683_v17 }
 0x1c8   : > { %743 = vst [vmem:[%s1418_s22 + $0x40] sm:$0xff] %v727_v18 }
 0x1cd   : > { %v685_v21 = vpop.f32.mrf.mxu2 }
 0x1ce   : > { %v728_v22 = vadd.f32 %v712_v20, %v685_v21 }
 0x1d0   : > { %744 = vst [vmem:[%s1418_s22 + $0x48] sm:$0xff] %v728_v22 }
 0x1d5   : > { %v688_v25 = vpop.f32.mrf.mxu2 }
 0x1d6   : > { %v729_v19 = vadd.f32 %v713_v24, %v688_v25 }
 0x1d8   : > { %745 = vst [vmem:[%s1418_s22 + $0x50] sm:$0xff] %v729_v19 }
 0x1dd   : > { %v690_v28 = vpop.f32.mrf.mxu2 }
 0x1de   : > { %v730_v29 = vadd.f32 %v714_v27, %v690_v28 }
 0x1e0   : > { %746 = vst [vmem:[%s1418_s22 + $0x58] sm:$0xff] %v730_v29 }
 0x1e5   : > { %v693_v31 = vpop.f32.mrf.mxu2 }
 0x1e6   : > { %v731_v32 = vadd.f32 %v715_v30, %v693_v31 }
 0x1e8   : > { %747 = vst [vmem:[%s1418_s22 + $0x60] sm:$0xff] %v731_v32 }
 0x1ed   : > { %v695_v34 = vpop.f32.mrf.mxu2 }
 0x1ee   : > { %v732_v35 = vadd.f32 %v716_v33, %v695_v34 }
 0x1f0   : > { %748 = vst [vmem:[%s1418_s22 + $0x68] sm:$0xff] %v732_v35 }
 0x1f5   : > { %v698_v36 = vpop.f32.mrf.mxu2 }
 0x1f6   : > { %v733_v37 = vadd.f32 %v717_v58, %v698_v36 }
 0x1f8   : > { %749 = vst [vmem:[%s1418_s22 + $0x70] sm:$0xff] %v733_v37 }
 0x1fc   : > { %758 = sbr.rel (!%p1364_p12) target bundleno = 544 (0x220), region = 52 }
 0x1fd   : > { %v700_v39 = vpop.f32.mrf.mxu2 }
 0x1fe   : > { %v734_v40 = vadd.f32 %v718_v38, %v700_v39 }
 0x200   : > { %750 = vst [vmem:[%s1418_s22 + $0x78] sm:$0xff] %v734_v40 }
 0x201   : > { %s1697_s23 = smov (!%p761_p11, %s760_s23), 16 }
 0x202   : > { %s915_s6 = sshll.u32 %s1697_s23, 3 }
 0x203   : > { %s764_s10 = ssub.s32 128, %s915_s6 }
 0x204   : > { %s765_s12 = sshll.u32 %s764_s10, 4 }
 0x205   : > { %766 = vsyncadd %s1566_s8, %s765_s12  ;;  %p1575_p13 = scmp.ne.s32.totalorder %s915_s6, 0  ;;  %s922_s16 = sshll.u32 %s1226_s25, 7 }
 0x206   : > { %s769_s14 = scalar_lea.hbm %s1652_s5, %s922_s16  ;;  %s771_s30 = sshll.u32 %s1418_s22, 4  ;;  %s1584_s30 = int_to_ptr.vmem [resolvable:$true] %s771_s30 }
 0x207   : > { %s773_s29 = sshll.u32 %s769_s14, 4  ;;  %s919_s9 = sshll.u32 %s1697_s23, 7  ;;  %s1586_s29 = int_to_ptr.hbm [resolvable:$true] %s773_s29 }
 0x208   : > { %s1105_s13 = sshra.s32 %s1584_s30, 4  ;;  %s1107_s7 = sshrl.u32 %s919_s9, 4  ;;  %s1106_s13 = int_to_ptr.vmem [resolvable:$true] %s1105_s13 }
 0x209   : > { %s1112_s11 = scalar_lea.vmem %s1106_s13, %s1107_s7  ;;  %s1243_s25 = smov [#allocation5]  }
 0x20a   : > { %p1113_p12 = scmp.ne.s32.totalorder %s1106_s13, %s1112_s11  ;;  %s1116_s1 = scalar_lea.vmem %s1243_s25, 256 }
 0x20b   : > { %p1118_p4 = scmp.lt.s32.totalorder %s1116_s1, %s1112_s11 }
 0x20c   : > { %p1114_p0 = pnand %p1113_p12, %p1575_p13 }
 0x20e   : > { %p1115_p1 = pneg %p1114_p0 }
 0x210   : > { %p1120_p5 = pnand %p1118_p4, %p1115_p1 }
 0x212   : > { %1123 = shalt.err (!%p1120_p5)
}
 0x213   : > { %s1124_s22 = sshra.s32 %s1586_s29, 4  ;;  %s1135_s10 = scalar_lea.hbm %s1652_s5, 200  ;;  %s1125_s22 = int_to_ptr.hbm [resolvable:$true] %s1124_s22 }
 0x214   : > { %s1131_s24 = scalar_lea.hbm %s1125_s22, %s1107_s7  ;;  %p1136_p9 = scmp.lt.s32.totalorder %s1125_s22, %s1652_s5 }
 0x215   : > { %p1132_p6 = scmp.ne.s32.totalorder %s1125_s22, %s1131_s24  ;;  %p1137_p8 = scmp.lt.s32.totalorder %s1135_s10, %s1131_s24 }
 0x217   : > { %p1133_p7 = pnand %p1132_p6, %p1575_p13  ;;  %p1138_p10 = por %p1137_p8, %p1136_p9 }
 0x219   : > { %p1134_p3 = pneg %p1133_p7 }
 0x21b   : > { %p1139_p11 = pnand %p1138_p10, %p1134_p3 }
 0x21d   : > { %1142 = shalt.err (!%p1139_p11)
}
 0x21e   : > { %s1244_s17 = smov 128   ;;  %s1245_s27 = smov 8  }
 0x21f   : > { %779 = dma.vmem_to_hbm [thread:$0]  (%p1575_p13), %s1584_s30, %s919_s9, %s1586_s29, %s1566_s8, %s1244_s17, %s1244_s17, %s1245_s27  }
 0x220 PF: > { %p947_p12 = scmp.ge.s32.totalorder %s1238_s28, 2  ;;  %s788_s14 = sand.u32 1, %s1198_s18  }
 0x221   : > { %s789_s13 = scalar_lea.sflag [#allocation4], %s788_s14 }
 0x222   : > { %p943_p0 = pnand %p947_p12, %p1372_p2 }
 0x224   : > { %p944_p1 = pneg %p943_p0 }
 0x226   : > { %1193 = dma.done.wait (%p944_p1), %s789_s13, 2048  }
 0x227   : > { %1195 = vsyncadd (%p944_p1), %s789_s13, 4294965248  ;;  %s21_s28 = sadd.s32 1, %s1238_s28   ;;  %s1676_s23 = sld [smem:[#allocation15_spill]] }
 0x228   : > { %p18_p4 = scmp.ge.s32.totalorder %s21_s28, 6   ;;  %s1677_s21 = sld [smem:[#allocation8_spill]] }
 0x229   : > { %s1678_s22 = sld [smem:[#allocation9_spill]]  ;;  %s1684_s18 = smov %s1202_s19 }
 0x22a   : > { %s1679_s8 = sld [smem:[#allocation14_spill]]  ;;  %s1685_s19 = smov %s1206_s20 }
 0x22b   : > { %s1680_s24 = sld [smem:[#allocation10_spill]] }
 0x22c   : > { %s1681_s25 = sld [smem:[#allocation11_spill]]  ;;  %20 = sbr.rel (!%p18_p4) target bundleno = 11 (0xb), region = 98 }
 0x22d   : > { %s1682_s26 = sld [smem:[#allocation12_spill]]  ;;  %s1686_s20 = smov %s1676_s23 }
 0x22e   : > { %s1683_s27 = sld [smem:[#allocation13_spill]] }
 0x230   : > { %s1687_s23 = smov %s1679_s8 }
 0x231   :  { %795 = vsyncpa [#allocation3], 1 }
 0x232   :  { %797 = vsyncpa [#allocation3 + $0x1], 1 }
 0x233   :  { %798 = vsyncpa [#allocation4], 1 }
 0x234   :  { %800 = vsyncpa [#allocation4 + $0x1], 1 }

</bundles_post_ra>
